<compile_context>
chip_gen: v7x
topology: tpu7x:2x2x1
jax: 0.10.0
libtpu: 0.0.40
codegen_flags: <defaults>
</compile_context>

<pallas_src>
import numpy as np
import jax
import jax.numpy as jnp
from jax import lax
from jax.experimental import pallas as pl
from jax.experimental.pallas import tpu as pltpu


# ----------------------------------------------------------------------------
# Fused conv stack: [Conv1d(no bias) + folded BN + ReLU] x L in one kernel.
# ----------------------------------------------------------------------------
def _make_conv_stack_kernel(num_layers, K, pad, T):
    def kernel(*refs):
        # refs: x_pad, w_0..w_{L-1}, scale_0.., shift_0.., o_ref, buf_a, buf_b
        x_ref = refs[0]
        w_refs = refs[1:1 + num_layers]
        s_refs = refs[1 + num_layers:1 + 2 * num_layers]
        h_refs = refs[1 + 2 * num_layers:1 + 3 * num_layers]
        o_ref = refs[1 + 3 * num_layers]
        buf_a = refs[2 + 3 * num_layers]
        buf_b = refs[3 + 3 * num_layers]

        # Zero once so halo rows of the ping-pong buffers stay zero ("same" padding).
        buf_a[...] = jnp.zeros_like(buf_a)
        buf_b[...] = jnp.zeros_like(buf_b)
        bufs = [buf_a, buf_b]

        def run_layer(l, read_tap):
            w_ref = w_refs[l]                      # (K, Cin, Cout)
            cout = w_ref.shape[2]
            acc = jnp.zeros((T, cout), jnp.float32)
            for k in range(K):                     # static unroll: K shifted MXU matmuls
                acc = acc + jnp.dot(read_tap(k), w_ref[k],
                                    preferred_element_type=jnp.float32)
            y = acc * s_refs[l][...] + h_refs[l][...]   # folded eval-mode BatchNorm
            return jnp.maximum(y, 0.0)                  # ReLU (Dropout = identity in eval)

        for l in range(num_layers):
            if l == 0:
                read_tap = lambda k: x_ref[0, k:k + T, :]
            else:
                src = bufs[(l - 1) % 2]
                read_tap = (lambda s: (lambda k: s[k:k + T, :]))(src)
            y = run_layer(l, read_tap)
            if l == num_layers - 1:
                o_ref[0] = y
            else:
                bufs[l % 2][pad:pad + T, :] = y

    return kernel


def conv_stack(x, convs):
    # x: (B, T, E); convs: list of (w (K, Cin, Cout), scale (1, C), shift (1, C))
    B, T, E = x.shape
    L = len(convs)
    if L == 0:
        return x
    K = convs[0][0].shape[0]
    C = convs[0][0].shape[2]
    pad = (K - 1) // 2
    x_pad = jnp.pad(x, ((0, 0), (pad, pad), (0, 0)))     # single pad for the whole stack
    Tp = T + 2 * pad

    ws = [c[0] for c in convs]
    scales = [c[1] for c in convs]
    shifts = [c[2] for c in convs]

    in_specs = [pl.BlockSpec((1, Tp, E), lambda b: (b, 0, 0))]
    in_specs += [pl.BlockSpec(w.shape, lambda b: (0, 0, 0)) for w in ws]
    in_specs += [pl.BlockSpec(s.shape, lambda b: (0, 0)) for s in scales]
    in_specs += [pl.BlockSpec(s.shape, lambda b: (0, 0)) for s in shifts]

    return pl.pallas_call(
        _make_conv_stack_kernel(L, K, pad, T),
        out_shape=jax.ShapeDtypeStruct((B, T, C), jnp.float32),
        grid=(B,),
        in_specs=in_specs,
        out_specs=pl.BlockSpec((1, T, C), lambda b: (b, 0, 0)),
        scratch_shapes=[pltpu.VMEM((Tp, C), jnp.float32),
                        pltpu.VMEM((Tp, C), jnp.float32)],
        compiler_params=pltpu.CompilerParams(dimension_semantics=("parallel",)),
    )(x_pad, *ws, *scales, *shifts)


# ----------------------------------------------------------------------------
# Bidirectional LSTM with packed-sequence (length mask) semantics, one kernel.
# Gate order follows PyTorch: i, f, g, o.  Both directions walk the SAME loop.
# ----------------------------------------------------------------------------
def _bilstm_kernel(x_ref, lens_ref, wih_ref, b_ref, whh_f_ref, whh_r_ref,
                   o_ref, gxf_sc, gxr_sc, outf_sc, outr_sc):
    TB = x_ref.shape[0]
    B = lens_ref.shape[0]
    T = TB // B
    H = whh_f_ref.shape[0]
    G = 4 * H

    # Hoisted input projection: ONE big MXU matmul for all timesteps & both
    # directions, with biases folded in once (no per-step broadcast).
    gx = (jnp.dot(x_ref[...], wih_ref[...], preferred_element_type=jnp.float32)
          + b_ref[...])
    gxf_sc[...] = gx[:, :G]
    gxr_sc[...] = gx[:, G:]

    whh_f = whh_f_ref[...]
    whh_r = whh_r_ref[...]
    lens_v = lens_ref[...]                       # (B, 1) int32, loop-invariant

    def cell(gates, c):
        i = jax.nn.sigmoid(gates[:, 0:H])
        f = jax.nn.sigmoid(gates[:, H:2 * H])
        g = jnp.tanh(gates[:, 2 * H:3 * H])
        o = jax.nn.sigmoid(gates[:, 3 * H:4 * H])
        c_new = f * c + i * g
        h_new = o * jnp.tanh(c_new)
        return h_new, c_new

    zeros = jnp.zeros((B, H), jnp.float32)

    def body(t, carry):
        h_f, c_f, h_r, c_r = carry
        tr = T - 1 - t
        rf = pl.multiple_of(t * B, B)
        rr = pl.multiple_of(tr * B, B)

        gates_f = gxf_sc[pl.ds(rf, B), :] + jnp.dot(
            h_f, whh_f, preferred_element_type=jnp.float32)
        gates_r = gxr_sc[pl.ds(rr, B), :] + jnp.dot(
            h_r, whh_r, preferred_element_type=jnp.float32)

        hf_new, cf_new = cell(gates_f, c_f)
        hr_new, cr_new = cell(gates_r, c_r)

        # packed-sequence semantics: state freezes past each sequence's length;
        # scalar compare against the cached lengths vector (no mask array / lane gather).
        m_f = (t < lens_v).astype(jnp.float32)    # (B, 1)
        m_r = (tr < lens_v).astype(jnp.float32)

        h_f = m_f * hf_new + (1.0 - m_f) * h_f
        c_f = m_f * cf_new + (1.0 - m_f) * c_f
        h_r = m_r * hr_new + (1.0 - m_r) * h_r
        c_r = m_r * cr_new + (1.0 - m_r) * c_r

        # zero-pad outputs past length (pad_packed_sequence); stores go to VMEM scratch.
        outf_sc[pl.ds(rf, B), :] = m_f * hf_new
        outr_sc[pl.ds(rr, B), :] = m_r * hr_new
        return h_f, c_f, h_r, c_r

    lax.fori_loop(0, T, body, (zeros, zeros, zeros, zeros))

    # Bulk lane-dense store: both directions fused into a single (T*B, 2H) output.
    o_ref[:, 0:H] = outf_sc[...]
    o_ref[:, H:2 * H] = outr_sc[...]


def bilstm(x, ilens, wih_f, whh_f, b_f, wih_r, whh_r, b_r):
    # x: (B, T, Cin) -> time-major (T*B, Cin) so each timestep is a contiguous row block.
    B, T, Cin = x.shape
    H = whh_f.shape[0]
    x_tb = jnp.transpose(x, (1, 0, 2)).reshape(T * B, Cin)
    lens = ilens.astype(jnp.int32).reshape(B, 1)
    wih_cat = jnp.concatenate([wih_f, wih_r], axis=1)     # (Cin, 8H)
    b_cat = jnp.concatenate([b_f, b_r], axis=1)           # (1, 8H)

    def fs(shape):
        n = len(shape)
        return pl.BlockSpec(shape, lambda i, _n=n: (0,) * _n)

    out2d = pl.pallas_call(
        _bilstm_kernel,
        out_shape=jax.ShapeDtypeStruct((T * B, 2 * H), jnp.float32),
        grid=(1,),
        in_specs=[fs(x_tb.shape), fs(lens.shape), fs(wih_cat.shape), fs(b_cat.shape),
                  fs(whh_f.shape), fs(whh_r.shape)],
        out_specs=fs((T * B, 2 * H)),
        scratch_shapes=[pltpu.VMEM((T * B, 4 * H), jnp.float32),   # gates_x fwd
                        pltpu.VMEM((T * B, 4 * H), jnp.float32),   # gates_x rev
                        pltpu.VMEM((T * B, H), jnp.float32),       # out fwd accum
                        pltpu.VMEM((T * B, H), jnp.float32)],      # out rev accum
        compiler_params=pltpu.CompilerParams(dimension_semantics=("arbitrary",)),
    )(x_tb, lens, wih_cat, b_cat, whh_f, whh_r)

    return jnp.transpose(out2d.reshape(T, B, 2 * H), (1, 0, 2))    # (B, T, 2H)


# ----------------------------------------------------------------------------
# Parameters (deterministic synthetic init) and forward wrapper.
# ----------------------------------------------------------------------------
def init_params(key, idim, embed_dim, econv_layers, econv_chans, econv_filts, eunits):
    H = eunits // 2
    eps = 1e-5
    k_embed, k_conv, k_lstm = jax.random.split(key, 3)
    embed = 0.1 * jax.random.normal(k_embed, (idim, embed_dim), jnp.float32)

    convs = []
    ck = jax.random.split(k_conv, max(econv_layers, 1))
    for l in range(econv_layers):
        cin = embed_dim if l == 0 else econv_chans
        kw, kg, kb, km, kv = jax.random.split(ck[l], 5)
        w = 0.1 * jax.random.normal(kw, (econv_filts, cin, econv_chans), jnp.float32)
        gamma = 1.0 + 0.1 * jax.random.normal(kg, (econv_chans,), jnp.float32)
        beta = 0.1 * jax.random.normal(kb, (econv_chans,), jnp.float32)
        mean = 0.1 * jax.random.normal(km, (econv_chans,), jnp.float32)
        var = 0.5 + jnp.abs(jax.random.normal(kv, (econv_chans,), jnp.float32))
        scale = gamma / jnp.sqrt(var + eps)
        shift = beta - mean * scale
        convs.append((w, scale.reshape(1, -1), shift.reshape(1, -1)))

    iunits = econv_chans if econv_layers > 0 else embed_dim
    lk = jax.random.split(k_lstm, 6)
    wih_f = 0.1 * jax.random.normal(lk[0], (iunits, 4 * H), jnp.float32)
    whh_f = 0.1 * jax.random.normal(lk[1], (H, 4 * H), jnp.float32)
    b_f = 0.1 * jax.random.normal(lk[2], (1, 4 * H), jnp.float32)     # b_ih + b_hh folded
    wih_r = 0.1 * jax.random.normal(lk[3], (iunits, 4 * H), jnp.float32)
    whh_r = 0.1 * jax.random.normal(lk[4], (H, 4 * H), jnp.float32)
    b_r = 0.1 * jax.random.normal(lk[5], (1, 4 * H), jnp.float32)
    return {"embed": embed, "convs": convs,
            "lstm": (wih_f, whh_f, b_f, wih_r, whh_r, b_r)}


def encoder_forward(params, ids, ilens):
    # ids: (B, Tmax) int32 character ids; ilens: (B,) int32 lengths (descending).
    x = jnp.take(params["embed"], ids, axis=0)            # (B, T, E) — embedding gather (glue)
    x = conv_stack(x, params["convs"])                     # (B, T, C) — single fused kernel
    out = bilstm(x, ilens, *params["lstm"])                # (B, T, eunits); zero past ilens
    return out, [int(l) for l in np.asarray(ilens)]


# ----------------------------------------------------------------------------
# Pure-JAX reference (same math, HIGHEST precision) for a correctness check.
# ----------------------------------------------------------------------------
def reference_forward(params, ids, ilens):
    hp = jax.lax.Precision.HIGHEST
    x = params["embed"][ids]
    for (w, scale, shift) in params["convs"]:
        K = w.shape[0]
        pad = (K - 1) // 2
        B, T, _ = x.shape
        x_pad = jnp.pad(x, ((0, 0), (pad, pad), (0, 0)))
        y = jnp.zeros((B, T, w.shape[2]), jnp.float32)
        for k in range(K):
            y = y + jnp.einsum("btc,co->bto", x_pad[:, k:k + T, :], w[k], precision=hp)
        x = jnp.maximum(y * scale[None] + shift[None], 0.0)

    wih_f, whh_f, b_f, wih_r, whh_r, b_r = params["lstm"]
    B, T, _ = x.shape
    H = whh_f.shape[0]
    mask = (jnp.arange(T)[None, :] < ilens[:, None]).astype(jnp.float32)

    def lstm_dir(xseq, wih, whh, b, reverse):
        h = jnp.zeros((B, H), jnp.float32)
        c = jnp.zeros((B, H), jnp.float32)
        outs = [None] * T
        order = range(T - 1, -1, -1) if reverse else range(T)
        for t in order:
            x_t = xseq[:, t, :]
            m_t = mask[:, t][:, None]
            gates = jnp.dot(x_t, wih, precision=hp) + jnp.dot(h, whh, precision=hp) + b
            i = jax.nn.sigmoid(gates[:, 0:H])
            f = jax.nn.sigmoid(gates[:, H:2 * H])
            g = jnp.tanh(gates[:, 2 * H:3 * H])
            o = jax.nn.sigmoid(gates[:, 3 * H:4 * H])
            c_new = f * c + i * g
            h_new = o * jnp.tanh(c_new)
            c = m_t * c_new + (1.0 - m_t) * c
            h = m_t * h_new + (1.0 - m_t) * h
            outs[t] = h * m_t
        return jnp.stack(outs, axis=1)

    out_f = lstm_dir(x, wih_f, whh_f, b_f, reverse=False)
    out_r = lstm_dir(x, wih_r, whh_r, b_r, reverse=True)
    return jnp.concatenate([out_f, out_r], axis=-1)


if __name__ == "__main__":
    # Small shapes consistent with the module: B=2, Tmax=8, idim=11,
    # embed_dim=32, econv_layers=3, econv_chans=32, econv_filts=5, eunits=32.
    idim, embed_dim, econv_layers, econv_chans, econv_filts, eunits = 11, 32, 3, 32, 5, 32
    B, T = 2, 8

    key = jax.random.PRNGKey(0)
    pkey, dkey = jax.random.split(key)
    params = init_params(pkey, idim, embed_dim, econv_layers, econv_chans,
                         econv_filts, eunits)
    ids = jax.random.randint(dkey, (B, T), 0, idim, dtype=jnp.int32)
    ilens = jnp.array([T, 5], dtype=jnp.int32)   # descending, max == Tmax (pack_padded convention)

    out, hlens = encoder_forward(params, ids, ilens)
    out = jax.block_until_ready(out)

    ref = reference_forward(params, ids, ilens)
    np.testing.assert_allclose(np.asarray(out), np.asarray(ref), rtol=2e-3, atol=2e-3)
    assert out.shape == (B, T, eunits) and hlens == [T, 5]
    print("KERNEL_OK")
</pallas_src>

<mosaic_0001>
module attributes {stable_mosaic.version = 11 : i64} {
  func.func @kernel(%arg0: i32, %arg1: memref<1x12x32xf32, #tpu.memory_space<vmem>>, %arg2: memref<5x32x32xf32, #tpu.memory_space<vmem>>, %arg3: memref<5x32x32xf32, #tpu.memory_space<vmem>>, %arg4: memref<5x32x32xf32, #tpu.memory_space<vmem>>, %arg5: memref<1x32xf32, #tpu.memory_space<vmem>>, %arg6: memref<1x32xf32, #tpu.memory_space<vmem>>, %arg7: memref<1x32xf32, #tpu.memory_space<vmem>>, %arg8: memref<1x32xf32, #tpu.memory_space<vmem>>, %arg9: memref<1x32xf32, #tpu.memory_space<vmem>>, %arg10: memref<1x32xf32, #tpu.memory_space<vmem>>, %arg11: memref<1x8x32xf32, #tpu.memory_space<vmem>>, %arg12: memref<12x32xf32, #tpu.memory_space<vmem>>, %arg13: memref<12x32xf32, #tpu.memory_space<vmem>>) attributes {dimension_semantics = [#tpu.dimension_semantics<parallel>], iteration_bounds = array<i64: 2>, scalar_prefetch = 0 : i64, scratch_operands = 2 : i64, tpu.core_type = #tpu.core_type<tc>, window_params = [{transform_indices = @transform_0, window_bounds = array<i64: 1, 12, 32>}, {pipeline_mode = #tpu.pipeline_mode<synchronous>, transform_indices = @transform_1, window_bounds = array<i64: 5, 32, 32>}, {pipeline_mode = #tpu.pipeline_mode<synchronous>, transform_indices = @transform_2, window_bounds = array<i64: 5, 32, 32>}, {pipeline_mode = #tpu.pipeline_mode<synchronous>, transform_indices = @transform_3, window_bounds = array<i64: 5, 32, 32>}, {pipeline_mode = #tpu.pipeline_mode<synchronous>, transform_indices = @transform_4, window_bounds = array<i64: 1, 32>}, {pipeline_mode = #tpu.pipeline_mode<synchronous>, transform_indices = @transform_5, window_bounds = array<i64: 1, 32>}, {pipeline_mode = #tpu.pipeline_mode<synchronous>, transform_indices = @transform_6, window_bounds = array<i64: 1, 32>}, {pipeline_mode = #tpu.pipeline_mode<synchronous>, transform_indices = @transform_7, window_bounds = array<i64: 1, 32>}, {pipeline_mode = #tpu.pipeline_mode<synchronous>, transform_indices = @transform_8, window_bounds = array<i64: 1, 32>}, {pipeline_mode = #tpu.pipeline_mode<synchronous>, transform_indices = @transform_9, window_bounds = array<i64: 1, 32>}, {transform_indices = @transform_10, window_bounds = array<i64: 1, 8, 32>}]} {
    %cst = arith.constant 0.000000e+00 : f32
    %0 = vector.broadcast %cst : f32 to vector<12x32xf32>
    %c0 = arith.constant 0 : index
    %c0_0 = arith.constant 0 : index
    %1 = vector.load %arg12[%c0, %c0_0] : memref<12x32xf32, #tpu.memory_space<vmem>>, vector<12x32xf32>
    tpu.vector_store %arg12[%c0, %c0_0], %0 {strides = array<i32>} : memref<12x32xf32, #tpu.memory_space<vmem>>, vector<12x32xf32>,
    %cst_1 = arith.constant 0.000000e+00 : f32
    %2 = vector.broadcast %cst_1 : f32 to vector<12x32xf32>
    %c0_2 = arith.constant 0 : index
    %c0_3 = arith.constant 0 : index
    %3 = vector.load %arg13[%c0_2, %c0_3] : memref<12x32xf32, #tpu.memory_space<vmem>>, vector<12x32xf32>
    tpu.vector_store %arg13[%c0_2, %c0_3], %2 {strides = array<i32>} : memref<12x32xf32, #tpu.memory_space<vmem>>, vector<12x32xf32>,
    %cst_4 = arith.constant 0.000000e+00 : f32
    %4 = vector.broadcast %cst_4 : f32 to vector<8x32xf32>
    %c0_5 = arith.constant 0 : index
    %c0_6 = arith.constant 0 : index
    %c0_7 = arith.constant 0 : index
    %5 = vector.load %arg1[%c0_5, %c0_6, %c0_7] : memref<1x12x32xf32, #tpu.memory_space<vmem>>, vector<1x8x32xf32>
    %6 = vector.shape_cast %5 : vector<1x8x32xf32> to vector<8x32xf32>
    %c0_8 = arith.constant 0 : index
    %c0_9 = arith.constant 0 : index
    %c0_10 = arith.constant 0 : index
    %7 = vector.load %arg2[%c0_8, %c0_9, %c0_10] : memref<5x32x32xf32, #tpu.memory_space<vmem>>, vector<1x32x32xf32>
    %8 = vector.shape_cast %7 : vector<1x32x32xf32> to vector<32x32xf32>
    %cst_11 = arith.constant dense<0.000000e+00> : vector<8x32xf32>
    %9 = tpu.matmul %6, %8, %cst_11 {dimension_numbers = #tpu.dot_dimension_numbers<[1], [0], [0], [1], [0, 0, 1, 1], [], []>} : vector<8x32xf32>, vector<32x32xf32>, vector<8x32xf32> -> vector<8x32xf32>
    %10 = arith.addf %4, %9 : vector<8x32xf32>
    %c0_12 = arith.constant 0 : index
    %c1 = arith.constant 1 : index
    %c0_13 = arith.constant 0 : index
    %11 = vector.load %arg1[%c0_12, %c1, %c0_13] : memref<1x12x32xf32, #tpu.memory_space<vmem>>, vector<1x8x32xf32>
    %12 = vector.shape_cast %11 : vector<1x8x32xf32> to vector<8x32xf32>
    %c1_14 = arith.constant 1 : index
    %c0_15 = arith.constant 0 : index
    %c0_16 = arith.constant 0 : index
    %13 = vector.load %arg2[%c1_14, %c0_15, %c0_16] : memref<5x32x32xf32, #tpu.memory_space<vmem>>, vector<1x32x32xf32>
    %14 = vector.shape_cast %13 : vector<1x32x32xf32> to vector<32x32xf32>
    %cst_17 = arith.constant dense<0.000000e+00> : vector<8x32xf32>
    %15 = tpu.matmul %12, %14, %cst_17 {dimension_numbers = #tpu.dot_dimension_numbers<[1], [0], [0], [1], [0, 0, 1, 1], [], []>} : vector<8x32xf32>, vector<32x32xf32>, vector<8x32xf32> -> vector<8x32xf32>
    %16 = arith.addf %10, %15 : vector<8x32xf32>
    %c0_18 = arith.constant 0 : index
    %c2 = arith.constant 2 : index
    %c0_19 = arith.constant 0 : index
    %17 = vector.load %arg1[%c0_18, %c2, %c0_19] : memref<1x12x32xf32, #tpu.memory_space<vmem>>, vector<1x8x32xf32>
    %18 = vector.shape_cast %17 : vector<1x8x32xf32> to vector<8x32xf32>
    %c2_20 = arith.constant 2 : index
    %c0_21 = arith.constant 0 : index
    %c0_22 = arith.constant 0 : index
    %19 = vector.load %arg2[%c2_20, %c0_21, %c0_22] : memref<5x32x32xf32, #tpu.memory_space<vmem>>, vector<1x32x32xf32>
    %20 = vector.shape_cast %19 : vector<1x32x32xf32> to vector<32x32xf32>
    %cst_23 = arith.constant dense<0.000000e+00> : vector<8x32xf32>
    %21 = tpu.matmul %18, %20, %cst_23 {dimension_numbers = #tpu.dot_dimension_numbers<[1], [0], [0], [1], [0, 0, 1, 1], [], []>} : vector<8x32xf32>, vector<32x32xf32>, vector<8x32xf32> -> vector<8x32xf32>
    %22 = arith.addf %16, %21 : vector<8x32xf32>
    %c0_24 = arith.constant 0 : index
    %c3 = arith.constant 3 : index
    %c0_25 = arith.constant 0 : index
    %23 = vector.load %arg1[%c0_24, %c3, %c0_25] : memref<1x12x32xf32, #tpu.memory_space<vmem>>, vector<1x8x32xf32>
    %24 = vector.shape_cast %23 : vector<1x8x32xf32> to vector<8x32xf32>
    %c3_26 = arith.constant 3 : index
    %c0_27 = arith.constant 0 : index
    %c0_28 = arith.constant 0 : index
    %25 = vector.load %arg2[%c3_26, %c0_27, %c0_28] : memref<5x32x32xf32, #tpu.memory_space<vmem>>, vector<1x32x32xf32>
    %26 = vector.shape_cast %25 : vector<1x32x32xf32> to vector<32x32xf32>
    %cst_29 = arith.constant dense<0.000000e+00> : vector<8x32xf32>
    %27 = tpu.matmul %24, %26, %cst_29 {dimension_numbers = #tpu.dot_dimension_numbers<[1], [0], [0], [1], [0, 0, 1, 1], [], []>} : vector<8x32xf32>, vector<32x32xf32>, vector<8x32xf32> -> vector<8x32xf32>
    %28 = arith.addf %22, %27 : vector<8x32xf32>
    %c0_30 = arith.constant 0 : index
    %c4 = arith.constant 4 : index
    %c0_31 = arith.constant 0 : index
    %29 = vector.load %arg1[%c0_30, %c4, %c0_31] : memref<1x12x32xf32, #tpu.memory_space<vmem>>, vector<1x8x32xf32>
    %30 = vector.shape_cast %29 : vector<1x8x32xf32> to vector<8x32xf32>
    %c4_32 = arith.constant 4 : index
    %c0_33 = arith.constant 0 : index
    %c0_34 = arith.constant 0 : index
    %31 = vector.load %arg2[%c4_32, %c0_33, %c0_34] : memref<5x32x32xf32, #tpu.memory_space<vmem>>, vector<1x32x32xf32>
    %32 = vector.shape_cast %31 : vector<1x32x32xf32> to vector<32x32xf32>
    %cst_35 = arith.constant dense<0.000000e+00> : vector<8x32xf32>
    %33 = tpu.matmul %30, %32, %cst_35 {dimension_numbers = #tpu.dot_dimension_numbers<[1], [0], [0], [1], [0, 0, 1, 1], [], []>} : vector<8x32xf32>, vector<32x32xf32>, vector<8x32xf32> -> vector<8x32xf32>
    %34 = arith.addf %28, %33 : vector<8x32xf32>
    %c0_36 = arith.constant 0 : index
    %c0_37 = arith.constant 0 : index
    %35 = vector.load %arg5[%c0_36, %c0_37] : memref<1x32xf32, #tpu.memory_space<vmem>>, vector<1x32xf32>
    %36 = vector.broadcast %35 : vector<1x32xf32> to vector<8x32xf32>
    %37 = arith.mulf %34, %36 : vector<8x32xf32>
    %c0_38 = arith.constant 0 : index
    %c0_39 = arith.constant 0 : index
    %38 = vector.load %arg8[%c0_38, %c0_39] : memref<1x32xf32, #tpu.memory_space<vmem>>, vector<1x32xf32>
    %39 = vector.broadcast %38 : vector<1x32xf32> to vector<8x32xf32>
    %40 = arith.addf %37, %39 : vector<8x32xf32>
    %cst_40 = arith.constant 0.000000e+00 : f32
    %41 = vector.broadcast %cst_40 : f32 to vector<8x32xf32>
    %42 = arith.maximumf %40, %41 : vector<8x32xf32>
    %c2_41 = arith.constant 2 : index
    %c0_42 = arith.constant 0 : index
    %43 = vector.load %arg12[%c2_41, %c0_42] : memref<12x32xf32, #tpu.memory_space<vmem>>, vector<8x32xf32>
    tpu.vector_store %arg12[%c2_41, %c0_42], %42 {strides = array<i32>} : memref<12x32xf32, #tpu.memory_space<vmem>>, vector<8x32xf32>,
    %cst_43 = arith.constant 0.000000e+00 : f32
    %44 = vector.broadcast %cst_43 : f32 to vector<8x32xf32>
    %c0_44 = arith.constant 0 : index
    %c0_45 = arith.constant 0 : index
    %45 = vector.load %arg12[%c0_44, %c0_45] : memref<12x32xf32, #tpu.memory_space<vmem>>, vector<8x32xf32>
    %c0_46 = arith.constant 0 : index
    %c0_47 = arith.constant 0 : index
    %c0_48 = arith.constant 0 : index
    %46 = vector.load %arg3[%c0_46, %c0_47, %c0_48] : memref<5x32x32xf32, #tpu.memory_space<vmem>>, vector<1x32x32xf32>
    %47 = vector.shape_cast %46 : vector<1x32x32xf32> to vector<32x32xf32>
    %cst_49 = arith.constant dense<0.000000e+00> : vector<8x32xf32>
    %48 = tpu.matmul %45, %47, %cst_49 {dimension_numbers = #tpu.dot_dimension_numbers<[1], [0], [0], [1], [0, 0, 1, 1], [], []>} : vector<8x32xf32>, vector<32x32xf32>, vector<8x32xf32> -> vector<8x32xf32>
    %49 = arith.addf %44, %48 : vector<8x32xf32>
    %c1_50 = arith.constant 1 : index
    %c0_51 = arith.constant 0 : index
    %50 = vector.load %arg12[%c1_50, %c0_51] : memref<12x32xf32, #tpu.memory_space<vmem>>, vector<8x32xf32>
    %c1_52 = arith.constant 1 : index
    %c0_53 = arith.constant 0 : index
    %c0_54 = arith.constant 0 : index
    %51 = vector.load %arg3[%c1_52, %c0_53, %c0_54] : memref<5x32x32xf32, #tpu.memory_space<vmem>>, vector<1x32x32xf32>
    %52 = vector.shape_cast %51 : vector<1x32x32xf32> to vector<32x32xf32>
    %cst_55 = arith.constant dense<0.000000e+00> : vector<8x32xf32>
    %53 = tpu.matmul %50, %52, %cst_55 {dimension_numbers = #tpu.dot_dimension_numbers<[1], [0], [0], [1], [0, 0, 1, 1], [], []>} : vector<8x32xf32>, vector<32x32xf32>, vector<8x32xf32> -> vector<8x32xf32>
    %54 = arith.addf %49, %53 : vector<8x32xf32>
    %c2_56 = arith.constant 2 : index
    %c0_57 = arith.constant 0 : index
    %55 = vector.load %arg12[%c2_56, %c0_57] : memref<12x32xf32, #tpu.memory_space<vmem>>, vector<8x32xf32>
    %c2_58 = arith.constant 2 : index
    %c0_59 = arith.constant 0 : index
    %c0_60 = arith.constant 0 : index
    %56 = vector.load %arg3[%c2_58, %c0_59, %c0_60] : memref<5x32x32xf32, #tpu.memory_space<vmem>>, vector<1x32x32xf32>
    %57 = vector.shape_cast %56 : vector<1x32x32xf32> to vector<32x32xf32>
    %cst_61 = arith.constant dense<0.000000e+00> : vector<8x32xf32>
    %58 = tpu.matmul %55, %57, %cst_61 {dimension_numbers = #tpu.dot_dimension_numbers<[1], [0], [0], [1], [0, 0, 1, 1], [], []>} : vector<8x32xf32>, vector<32x32xf32>, vector<8x32xf32> -> vector<8x32xf32>
    %59 = arith.addf %54, %58 : vector<8x32xf32>
    %c3_62 = arith.constant 3 : index
    %c0_63 = arith.constant 0 : index
    %60 = vector.load %arg12[%c3_62, %c0_63] : memref<12x32xf32, #tpu.memory_space<vmem>>, vector<8x32xf32>
    %c3_64 = arith.constant 3 : index
    %c0_65 = arith.constant 0 : index
    %c0_66 = arith.constant 0 : index
    %61 = vector.load %arg3[%c3_64, %c0_65, %c0_66] : memref<5x32x32xf32, #tpu.memory_space<vmem>>, vector<1x32x32xf32>
    %62 = vector.shape_cast %61 : vector<1x32x32xf32> to vector<32x32xf32>
    %cst_67 = arith.constant dense<0.000000e+00> : vector<8x32xf32>
    %63 = tpu.matmul %60, %62, %cst_67 {dimension_numbers = #tpu.dot_dimension_numbers<[1], [0], [0], [1], [0, 0, 1, 1], [], []>} : vector<8x32xf32>, vector<32x32xf32>, vector<8x32xf32> -> vector<8x32xf32>
    %64 = arith.addf %59, %63 : vector<8x32xf32>
    %c4_68 = arith.constant 4 : index
    %c0_69 = arith.constant 0 : index
    %65 = vector.load %arg12[%c4_68, %c0_69] : memref<12x32xf32, #tpu.memory_space<vmem>>, vector<8x32xf32>
    %c4_70 = arith.constant 4 : index
    %c0_71 = arith.constant 0 : index
    %c0_72 = arith.constant 0 : index
    %66 = vector.load %arg3[%c4_70, %c0_71, %c0_72] : memref<5x32x32xf32, #tpu.memory_space<vmem>>, vector<1x32x32xf32>
    %67 = vector.shape_cast %66 : vector<1x32x32xf32> to vector<32x32xf32>
    %cst_73 = arith.constant dense<0.000000e+00> : vector<8x32xf32>
    %68 = tpu.matmul %65, %67, %cst_73 {dimension_numbers = #tpu.dot_dimension_numbers<[1], [0], [0], [1], [0, 0, 1, 1], [], []>} : vector<8x32xf32>, vector<32x32xf32>, vector<8x32xf32> -> vector<8x32xf32>
    %69 = arith.addf %64, %68 : vector<8x32xf32>
    %c0_74 = arith.constant 0 : index
    %c0_75 = arith.constant 0 : index
    %70 = vector.load %arg6[%c0_74, %c0_75] : memref<1x32xf32, #tpu.memory_space<vmem>>, vector<1x32xf32>
    %71 = vector.broadcast %70 : vector<1x32xf32> to vector<8x32xf32>
    %72 = arith.mulf %69, %71 : vector<8x32xf32>
    %c0_76 = arith.constant 0 : index
    %c0_77 = arith.constant 0 : index
    %73 = vector.load %arg9[%c0_76, %c0_77] : memref<1x32xf32, #tpu.memory_space<vmem>>, vector<1x32xf32>
    %74 = vector.broadcast %73 : vector<1x32xf32> to vector<8x32xf32>
    %75 = arith.addf %72, %74 : vector<8x32xf32>
    %cst_78 = arith.constant 0.000000e+00 : f32
    %76 = vector.broadcast %cst_78 : f32 to vector<8x32xf32>
    %77 = arith.maximumf %75, %76 : vector<8x32xf32>
    %c2_79 = arith.constant 2 : index
    %c0_80 = arith.constant 0 : index
    %78 = vector.load %arg13[%c2_79, %c0_80] : memref<12x32xf32, #tpu.memory_space<vmem>>, vector<8x32xf32>
    tpu.vector_store %arg13[%c2_79, %c0_80], %77 {strides = array<i32>} : memref<12x32xf32, #tpu.memory_space<vmem>>, vector<8x32xf32>,
    %cst_81 = arith.constant 0.000000e+00 : f32
    %79 = vector.broadcast %cst_81 : f32 to vector<8x32xf32>
    %c0_82 = arith.constant 0 : index
    %c0_83 = arith.constant 0 : index
    %80 = vector.load %arg13[%c0_82, %c0_83] : memref<12x32xf32, #tpu.memory_space<vmem>>, vector<8x32xf32>
    %c0_84 = arith.constant 0 : index
    %c0_85 = arith.constant 0 : index
    %c0_86 = arith.constant 0 : index
    %81 = vector.load %arg4[%c0_84, %c0_85, %c0_86] : memref<5x32x32xf32, #tpu.memory_space<vmem>>, vector<1x32x32xf32>
    %82 = vector.shape_cast %81 : vector<1x32x32xf32> to vector<32x32xf32>
    %cst_87 = arith.constant dense<0.000000e+00> : vector<8x32xf32>
    %83 = tpu.matmul %80, %82, %cst_87 {dimension_numbers = #tpu.dot_dimension_numbers<[1], [0], [0], [1], [0, 0, 1, 1], [], []>} : vector<8x32xf32>, vector<32x32xf32>, vector<8x32xf32> -> vector<8x32xf32>
    %84 = arith.addf %79, %83 : vector<8x32xf32>
    %c1_88 = arith.constant 1 : index
    %c0_89 = arith.constant 0 : index
    %85 = vector.load %arg13[%c1_88, %c0_89] : memref<12x32xf32, #tpu.memory_space<vmem>>, vector<8x32xf32>
    %c1_90 = arith.constant 1 : index
    %c0_91 = arith.constant 0 : index
    %c0_92 = arith.constant 0 : index
    %86 = vector.load %arg4[%c1_90, %c0_91, %c0_92] : memref<5x32x32xf32, #tpu.memory_space<vmem>>, vector<1x32x32xf32>
    %87 = vector.shape_cast %86 : vector<1x32x32xf32> to vector<32x32xf32>
    %cst_93 = arith.constant dense<0.000000e+00> : vector<8x32xf32>
    %88 = tpu.matmul %85, %87, %cst_93 {dimension_numbers = #tpu.dot_dimension_numbers<[1], [0], [0], [1], [0, 0, 1, 1], [], []>} : vector<8x32xf32>, vector<32x32xf32>, vector<8x32xf32> -> vector<8x32xf32>
    %89 = arith.addf %84, %88 : vector<8x32xf32>
    %c2_94 = arith.constant 2 : index
    %c0_95 = arith.constant 0 : index
    %90 = vector.load %arg13[%c2_94, %c0_95] : memref<12x32xf32, #tpu.memory_space<vmem>>, vector<8x32xf32>
    %c2_96 = arith.constant 2 : index
    %c0_97 = arith.constant 0 : index
    %c0_98 = arith.constant 0 : index
    %91 = vector.load %arg4[%c2_96, %c0_97, %c0_98] : memref<5x32x32xf32, #tpu.memory_space<vmem>>, vector<1x32x32xf32>
    %92 = vector.shape_cast %91 : vector<1x32x32xf32> to vector<32x32xf32>
    %cst_99 = arith.constant dense<0.000000e+00> : vector<8x32xf32>
    %93 = tpu.matmul %90, %92, %cst_99 {dimension_numbers = #tpu.dot_dimension_numbers<[1], [0], [0], [1], [0, 0, 1, 1], [], []>} : vector<8x32xf32>, vector<32x32xf32>, vector<8x32xf32> -> vector<8x32xf32>
    %94 = arith.addf %89, %93 : vector<8x32xf32>
    %c3_100 = arith.constant 3 : index
    %c0_101 = arith.constant 0 : index
    %95 = vector.load %arg13[%c3_100, %c0_101] : memref<12x32xf32, #tpu.memory_space<vmem>>, vector<8x32xf32>
    %c3_102 = arith.constant 3 : index
    %c0_103 = arith.constant 0 : index
    %c0_104 = arith.constant 0 : index
    %96 = vector.load %arg4[%c3_102, %c0_103, %c0_104] : memref<5x32x32xf32, #tpu.memory_space<vmem>>, vector<1x32x32xf32>
    %97 = vector.shape_cast %96 : vector<1x32x32xf32> to vector<32x32xf32>
    %cst_105 = arith.constant dense<0.000000e+00> : vector<8x32xf32>
    %98 = tpu.matmul %95, %97, %cst_105 {dimension_numbers = #tpu.dot_dimension_numbers<[1], [0], [0], [1], [0, 0, 1, 1], [], []>} : vector<8x32xf32>, vector<32x32xf32>, vector<8x32xf32> -> vector<8x32xf32>
    %99 = arith.addf %94, %98 : vector<8x32xf32>
    %c4_106 = arith.constant 4 : index
    %c0_107 = arith.constant 0 : index
    %100 = vector.load %arg13[%c4_106, %c0_107] : memref<12x32xf32, #tpu.memory_space<vmem>>, vector<8x32xf32>
    %c4_108 = arith.constant 4 : index
    %c0_109 = arith.constant 0 : index
    %c0_110 = arith.constant 0 : index
    %101 = vector.load %arg4[%c4_108, %c0_109, %c0_110] : memref<5x32x32xf32, #tpu.memory_space<vmem>>, vector<1x32x32xf32>
    %102 = vector.shape_cast %101 : vector<1x32x32xf32> to vector<32x32xf32>
    %cst_111 = arith.constant dense<0.000000e+00> : vector<8x32xf32>
    %103 = tpu.matmul %100, %102, %cst_111 {dimension_numbers = #tpu.dot_dimension_numbers<[1], [0], [0], [1], [0, 0, 1, 1], [], []>} : vector<8x32xf32>, vector<32x32xf32>, vector<8x32xf32> -> vector<8x32xf32>
    %104 = arith.addf %99, %103 : vector<8x32xf32>
    %c0_112 = arith.constant 0 : index
    %c0_113 = arith.constant 0 : index
    %105 = vector.load %arg7[%c0_112, %c0_113] : memref<1x32xf32, #tpu.memory_space<vmem>>, vector<1x32xf32>
    %106 = vector.broadcast %105 : vector<1x32xf32> to vector<8x32xf32>
    %107 = arith.mulf %104, %106 : vector<8x32xf32>
    %c0_114 = arith.constant 0 : index
    %c0_115 = arith.constant 0 : index
    %108 = vector.load %arg10[%c0_114, %c0_115] : memref<1x32xf32, #tpu.memory_space<vmem>>, vector<1x32xf32>
    %109 = vector.broadcast %108 : vector<1x32xf32> to vector<8x32xf32>
    %110 = arith.addf %107, %109 : vector<8x32xf32>
    %cst_116 = arith.constant 0.000000e+00 : f32
    %111 = vector.broadcast %cst_116 : f32 to vector<8x32xf32>
    %112 = arith.maximumf %110, %111 : vector<8x32xf32>
    %c0_117 = arith.constant 0 : index
    %c0_118 = arith.constant 0 : index
    %c0_119 = arith.constant 0 : index
    %113 = vector.load %arg11[%c0_117, %c0_118, %c0_119] : memref<1x8x32xf32, #tpu.memory_space<vmem>>, vector<1x8x32xf32>
    %114 = vector.shape_cast %113 : vector<1x8x32xf32> to vector<8x32xf32>
    %115 = vector.shape_cast %112 : vector<8x32xf32> to vector<1x8x32xf32>
    tpu.vector_store %arg11[%c0_117, %c0_118, %c0_119], %115 {strides = array<i32>} : memref<1x8x32xf32, #tpu.memory_space<vmem>>, vector<1x8x32xf32>,
    return
  }
  func.func @transform_0(%arg0: i32) -> (i32, i32, i32) {
    %c0_i32 = arith.constant 0 : i32
    %c0_i32_0 = arith.constant 0 : i32
    %c0_i32_1 = arith.constant 0 : i32
    return %arg0, %c0_i32, %c0_i32_0 : i32, i32, i32
  }
  func.func @transform_1(%arg0: i32) -> (i32, i32, i32) {
    %c0_i32 = arith.constant 0 : i32
    %c0_i32_0 = arith.constant 0 : i32
    %c0_i32_1 = arith.constant 0 : i32
    %c0_i32_2 = arith.constant 0 : i32
    return %c0_i32, %c0_i32_0, %c0_i32_1 : i32, i32, i32
  }
  func.func @transform_2(%arg0: i32) -> (i32, i32, i32) {
    %c0_i32 = arith.constant 0 : i32
    %c0_i32_0 = arith.constant 0 : i32
    %c0_i32_1 = arith.constant 0 : i32
    %c0_i32_2 = arith.constant 0 : i32
    return %c0_i32, %c0_i32_0, %c0_i32_1 : i32, i32, i32
  }
  func.func @transform_3(%arg0: i32) -> (i32, i32, i32) {
    %c0_i32 = arith.constant 0 : i32
    %c0_i32_0 = arith.constant 0 : i32
    %c0_i32_1 = arith.constant 0 : i32
    %c0_i32_2 = arith.constant 0 : i32
    return %c0_i32, %c0_i32_0, %c0_i32_1 : i32, i32, i32
  }
  func.func @transform_4(%arg0: i32) -> (i32, i32) {
    %c0_i32 = arith.constant 0 : i32
    %c0_i32_0 = arith.constant 0 : i32
    %c0_i32_1 = arith.constant 0 : i32
    return %c0_i32, %c0_i32_0 : i32, i32
  }
  func.func @transform_5(%arg0: i32) -> (i32, i32) {
    %c0_i32 = arith.constant 0 : i32
    %c0_i32_0 = arith.constant 0 : i32
    %c0_i32_1 = arith.constant 0 : i32
    return %c0_i32, %c0_i32_0 : i32, i32
  }
  func.func @transform_6(%arg0: i32) -> (i32, i32) {
    %c0_i32 = arith.constant 0 : i32
    %c0_i32_0 = arith.constant 0 : i32
    %c0_i32_1 = arith.constant 0 : i32
    return %c0_i32, %c0_i32_0 : i32, i32
  }
  func.func @transform_7(%arg0: i32) -> (i32, i32) {
    %c0_i32 = arith.constant 0 : i32
    %c0_i32_0 = arith.constant 0 : i32
    %c0_i32_1 = arith.constant 0 : i32
    return %c0_i32, %c0_i32_0 : i32, i32
  }
  func.func @transform_8(%arg0: i32) -> (i32, i32) {
    %c0_i32 = arith.constant 0 : i32
    %c0_i32_0 = arith.constant 0 : i32
    %c0_i32_1 = arith.constant 0 : i32
    return %c0_i32, %c0_i32_0 : i32, i32
  }
  func.func @transform_9(%arg0: i32) -> (i32, i32) {
    %c0_i32 = arith.constant 0 : i32
    %c0_i32_0 = arith.constant 0 : i32
    %c0_i32_1 = arith.constant 0 : i32
    return %c0_i32, %c0_i32_0 : i32, i32
  }
  func.func @transform_10(%arg0: i32) -> (i32, i32, i32) {
    %c0_i32 = arith.constant 0 : i32
    %c0_i32_0 = arith.constant 0 : i32
    %c0_i32_1 = arith.constant 0 : i32
    return %arg0, %c0_i32, %c0_i32_0 : i32, i32, i32
  }
}

</mosaic_0001>

<bundles_post_ra>
// kernel: tpu_custom_call.1
= control target key start
LH: loop header
LB: loop body
LE: loop exit
PB: predicated region body
PF: predicated region fallthrough
CT: control target
= control target key end

     0   :  { %15 = vsyncpa [#allocation5], 0  ;;  %s2762_s0 = inlined_call_operand.vmem [shape: f32[2,12,32], index: 0, kind: input, shape index: {}]   ;;  %s2763_s1 = inlined_call_operand.hbm [shape: f32[5,32,32], index: 1, kind: input, shape index: {}]   ;;  %s2764_s2 = inlined_call_operand.hbm [shape: f32[5,32,32], index: 2, kind: input, shape index: {}]   ;;  %s2765_s3 = inlined_call_operand.hbm [shape: f32[5,32,32], index: 3, kind: input, shape index: {}]   ;;  %s2766_s4 = inlined_call_operand.vmem [shape: f32[1,32], index: 4, kind: input, shape index: {}]   ;;  %s2767_s5 = inlined_call_operand.vmem [shape: f32[1,32], index: 5, kind: input, shape index: {}]   ;;  %s2768_s6 = inlined_call_operand.vmem [shape: f32[1,32], index: 6, kind: input, shape index: {}]   ;;  %s2769_s7 = inlined_call_operand.vmem [shape: f32[1,32], index: 7, kind: input, shape index: {}]   ;;  %s2770_s8 = inlined_call_operand.vmem [shape: f32[1,32], index: 8, kind: input, shape index: {}]   ;;  %s2771_s9 = inlined_call_operand.vmem [shape: f32[1,32], index: 9, kind: input, shape index: {}]   ;;  %s2772_s10 = inlined_call_operand.hbm [shape: f32[2,8,32], index: 10, kind: output, shape index: {}]  }
   0x1   :  { %16 = vsyncpa [#allocation8], 0 }
   0x2   :  { %17 = vsyncpa [#allocation6], 0 }
   0x3   :  { %19 = vsyncpa [#allocation6 + $0x1], 0  ;;  %s2444_s13 = smov 0   ;;  %s2446_s14 = smov 0  }
   0x4   :  { %s2448_s15 = smov 0   ;;  %s2450_s16 = smov 0  }
   0x5 LB: > { %2782 = sst [smem:[#allocation14_spill]] %s2366_s13  ;;  %s2465_s17 = sadd.s32 4294967295, %s2378_s16   ;;  %s2378_s16 = sphi %s2450_s16, %s2803_s16   ;;  %s2374_s15 = sphi %s2448_s15, %s2805_s15   ;;  %s2370_s14 = sphi %s2446_s14, %s2807_s14   ;;  %s2366_s13 = sphi %s2444_s13, %s2806_s13  }
   0x6   : > { %2783 = sst [smem:[#allocation15_spill]] %s2374_s15  ;;  %s1757_s18 = sadd.s32 4294967294, %s2378_s16  }
   0x7   : > { %2784 = sst [smem:[#allocation16_spill]] %s2378_s16  ;;  %s2469_s19 = sadd.s32 1, %s2378_s16  }
   0x8   : > { %2785 = sst [smem:[#allocation17_spill]] %s2469_s19  ;;  %s247_s20 = sadd.s32 1, %s2374_s15 }
   0x9   : > { %s244_s21 = ssub.s32 %s2378_s16, %s2469_s19  ;;  %p257_p0 = scmp.ne.s32.totalorder %s2374_s15, %s2370_s14 }
   0xa   : > { %p245_p1 = scmp.eq.s32.totalorder %s244_s21, 0  ;;  %p258_p2 = scmp.eq.s32.totalorder %s2465_s17, 1 }
   0xb   : > { %p263_p3 = scmp.ne.s32.totalorder %s2370_s14, %s2366_s13  ;;  %p264_p4 = scmp.eq.s32.totalorder %s1757_s18, 1 }
   0xc   : > { %s2480_s22 = scalar_select %p245_p1, %s2374_s15, %s247_s20  }
   0xd   : > { %p2482_p5 = por %p258_p2, %p257_p0  ;;  %p2486_p6 = por %p264_p4, %p263_p3 }
   0xe   : > { %2786 = sst [smem:[#allocation18_spill]] %s2480_s22  ;;  %p1758_p7 = scmp.ge.s32.totalorder %s2378_s16, 1 }
   0xf   : > { %s2787_s23 = scalar_select %p2482_p5, 1, 0 }
  0x10   : > { %s2788_s24 = scalar_select %p2486_p6, 1, 0 }
  0x11   : > { %p271_p8 = scmp.lt.s32.totalorder %s2378_s16, 3  ;;  %p2774_p9 = scmp.eq.s32.totalorder %s2465_s17, 0 }
  0x12   : > { %2789 = sst [smem:[#allocation19_spill]] %s2788_s24  ;;  %s2380_s26 = smov [#allocation7]  }
  0x13   : > { %p2493_p10 = pnand %p1758_p7, %p271_p8  ;;  %s296_s27 = sshll.u32 %s2380_s26, 4  ;;  %s2499_s27 = int_to_ptr.vmem [resolvable:$true] %s296_s27 }
  0x14   : > { %s2381_s29 = smov [#allocation4]   ;;  %s2382_s11 = smov [#allocation9]  }
  0x15   : > { %s2790_s25 = scalar_select %p2493_p10, 1, 0 }
  0x16   : > { %p2163_p11 = pneg %p2493_p10  ;;  %s283_s30 = sshll.u32 %s2381_s29, 4  ;;  %s2507_s30 = int_to_ptr.vmem [resolvable:$true] %s283_s30 }
  0x17   : > { %s2509_s12 = sshll.u32 %s2382_s11, 4  ;;  %s2224_s21 = scalar_lea.hbm %s2764_s2, 2560  ;;  %s310_s12 = int_to_ptr.vmem [resolvable:$true] %s2509_s12 }
  0x18   : > { %p2503_p12 = pnand %p2774_p9, %p2163_p11  ;;  %p2225_p13 = scmp.ne.s32.totalorder %s2764_s2, %s2224_s21 }
  0x19   : > { %p2231_p3 = scmp.lt.u32.totalorder %s2224_s21, %s2764_s2 }
  0x1a   : > { %p2519_p0 = pneg %p2503_p12 }
  0x1c   : > { %p2227_p1 = pnand %p2519_p0, %p2225_p13 }
  0x1e   : > { %p2228_p2 = pneg %p2227_p1 }
  0x20   : > { %p2233_p4 = pnand %p2231_p3, %p2228_p2 }
  0x22   : > { %2236 = shalt.err (!%p2233_p4)
}
  0x23   : > { %s2237_s22 = scalar_lea.vmem %s2499_s27, 2560  ;;  %p2245_p9 = scmp.lt.s32.totalorder %s2499_s27, %s2499_s27 }
  0x24   : > { %p2238_p7 = scmp.ne.s32.totalorder %s2499_s27, %s2237_s22  ;;  %p2246_p6 = scmp.lt.s32.totalorder %s2237_s22, %s2237_s22 }
  0x26   : > { %p2240_p8 = pnand %p2238_p7, %p2519_p0  ;;  %p2247_p13 = por %p2246_p6, %p2245_p9 }
  0x28   : > { %p2241_p11 = pneg %p2240_p8 }
  0x2a   : > { %p2248_p1 = pnand %p2247_p13, %p2241_p11 }
  0x2c   : > { %2251 = shalt.err (!%p2248_p1)
}
  0x2d   : > { %s2383_s18 = smov 128   ;;  %s2384_s20 = smov 8  }
  0x2e   : > { %2169 = dma.hbm_to_vmem [thread:$0]  (!%p2503_p12), %s2764_s2, 2560, %s2499_s27, [#allocation8], %s2383_s18, %s2383_s18, %s2384_s20  }
  0x2f   : > { %s2252_s22 = scalar_lea.hbm %s2763_s1, 2560 }
  0x30   : > { %p2253_p6 = scmp.ne.s32.totalorder %s2763_s1, %s2252_s22  ;;  %p2259_p3 = scmp.lt.u32.totalorder %s2252_s22, %s2763_s1 }
  0x32   : > { %p2255_p9 = pnand %p2253_p6, %p2519_p0 }
  0x34   : > { %p2256_p2 = pneg %p2255_p9 }
  0x36   : > { %p2261_p4 = pnand %p2259_p3, %p2256_p2 }
  0x38   : > { %2264 = shalt.err (!%p2261_p4)
}
  0x39   : > { %s2265_s27 = scalar_lea.vmem %s2507_s30, 2560  ;;  %p2273_p13 = scmp.lt.s32.totalorder %s2507_s30, %s2507_s30 }
  0x3a   : > { %p2266_p7 = scmp.ne.s32.totalorder %s2507_s30, %s2265_s27  ;;  %p2274_p1 = scmp.lt.s32.totalorder %s2265_s27, %s2265_s27 }
  0x3c   : > { %p2268_p8 = pnand %p2266_p7, %p2519_p0  ;;  %p2275_p6 = por %p2274_p1, %p2273_p13 }
  0x3e   : > { %p2269_p11 = pneg %p2268_p8 }
  0x40   : > { %p2276_p9 = pnand %p2275_p6, %p2269_p11 }
  0x42   : > { %2279 = shalt.err (!%p2276_p9)
}
  0x43   : > { %2166 = dma.hbm_to_vmem [thread:$0]  (!%p2503_p12), %s2763_s1, 2560, %s2507_s30, [#allocation5], %s2383_s18, %s2383_s18, %s2384_s20  }
  0x44   : > { %s2280_s21 = scalar_lea.hbm %s2765_s3, 2560 }
  0x45   : > { %p2281_p2 = scmp.ne.s32.totalorder %s2765_s3, %s2280_s21  ;;  %p2287_p7 = scmp.lt.u32.totalorder %s2280_s21, %s2765_s3 }
  0x47   : > { %p2283_p3 = pnand %p2281_p2, %p2519_p0 }
  0x49   : > { %p2284_p4 = pneg %p2283_p3 }
  0x4b   : > { %p2289_p8 = pnand %p2287_p7, %p2284_p4 }
  0x4d   : > { %2292 = shalt.err (!%p2289_p8)
}
  0x4e   : > { %s2293_s27 = scalar_lea.vmem %s310_s12, 2560  ;;  %p2301_p6 = scmp.lt.s32.totalorder %s310_s12, %s310_s12 }
  0x4f   : > { %p2294_p11 = scmp.ne.s32.totalorder %s310_s12, %s2293_s27  ;;  %p2302_p9 = scmp.lt.s32.totalorder %s2293_s27, %s2293_s27 }
  0x51   : > { %p2296_p13 = pnand %p2294_p11, %p2519_p0  ;;  %p2303_p5 = por %p2302_p9, %p2301_p6 }
  0x53   : > { %p2297_p1 = pneg %p2296_p13 }
  0x55   : > { %p2304_p10 = pnand %p2303_p5, %p2297_p1 }
  0x57   : > { %2307 = shalt.err (!%p2304_p10)
}
  0x58   : > { %2172 = dma.hbm_to_vmem [thread:$0]  (!%p2503_p12), %s2765_s3, 2560, %s310_s12, [#allocation8], %s2383_s18, %s2383_s18, %s2384_s20  }
  0x59   : > { %p2793_p2 = scmp.ne.s32.totalorder %s2790_s25, 0 }
  0x5a   : > { %p2794_p0 = scmp.eq.s32.totalorder (!%p2793_p2), %s2465_s17, 0 }
  0x5b   : > { %351 = sbr.rel (%p2793_p2) target bundleno = 880 (0x370), region = 60 }
  0x62   : > { %2353 = dma.done.wait (%p2794_p0), [#allocation5], 2560   ;;  %p2795_p3 = pmov %p2794_p0 }
  0x63   : > { %p2796_p5 = pmov %p2794_p0 }
  0x64   : > { %2355 = vsyncadd (%p2795_p3), [#allocation5], 4294964736 }
  0x65   : > { %2357 = dma.done.wait (%p2796_p5), [#allocation8], 5120   ;;  %p2797_p10 = pmov %p2794_p0 }
  0x66   : > { %p397_p4 = scmp.lt.s32.totalorder %s2465_s17, 1  ;;  %v2385_v0 = vmov 0.0|0.0   ;;  %vm402_vm0 = vcmask 261120   ;;  %vm2386_vm1 = vmmov 0   ;;  %v2387_v1 = vmov 0.0   ;;  %v415_v2 = vld [vmem:[#allocation4 + $0x20] sm:$0xff] }
  0x67   : > { %2359 = vsyncadd (%p2797_p10), [#allocation8], 4294962176  ;;  %2036 = vmatprep.subr.bf16.mxu1 %v2385_v0  ;;  %2048 = vmatprep.subr.bf16.mxu0 %v2385_v0  ;;  %403 = vst.msk [vmem:[#allocation2] sm:$0xff] %vm402_vm0, %v2387_v1  ;;  %v416_v3 = vld [vmem:[#allocation4 + $0x28] sm:$0xff]  ;;  %v567_v4 = vld [vmem:[#allocation4 + $0x40] sm:$0xff]  ;;  %vm404_vm2 = vcmask 257024  }
  0x68   : > { %1879 = vmatprep.mubr.msk.f32.mxu1 %vm2386_vm1, %v2387_v1  ;;  %1901 = vmatprep.mubr.msk.f32.mxu0 %vm2386_vm1, %v2387_v1  ;;  %406 = vst.msk [vmem:[#allocation3] sm:$0xff] %vm402_vm0, %v2387_v1  ;;  %s398_s15 = scalar_select %p397_p4, %s2465_s17, 1  ;;  %v2037_v5 = vpack.c.bf16 %v416_v3, %v415_v2  ;;  %v568_v6 = vld [vmem:[#allocation4 + $0x48] sm:$0xff]  ;;  %v417_v7 = vld [vmem:[#allocation4 + $0x30] sm:$0xff]  ;;  %v418_v8 = vld [vmem:[#allocation4 + $0x38] sm:$0xff] }
  0x69   : > { %v2049_v9 = vpack.c.bf16 %v568_v6, %v567_v4  ;;  %v569_v10 = vld [vmem:[#allocation4 + $0x50] sm:$0xff]  ;;  %v570_v11 = vld [vmem:[#allocation4 + $0x58] sm:$0xff]  ;;  %v2040_v12 = vpack.c.bf16 %v418_v8, %v417_v7  ;;  %v409_v14 = vld [vmem:[#allocation4] sm:$0xff]  ;;  %405 = vst.msk [vmem:[#allocation2 + $0x8] sm:$0xf] %vm404_vm2, %v2387_v1  ;;  %s394_s22 = sand.u32 1, %s2370_s14  }
  0x6a   : > { %s1795_s25 = sshll.u32 %s398_s15, 4  ;;  %2038 = vmatpush3.bf16.msra.mxu1 %v2037_v5  ;;  %v2052_v13 = vpack.c.bf16 %v570_v11, %v569_v10  ;;  %v410_v15 = vld [vmem:[#allocation4 + $0x8] sm:$0xff]  ;;  %v647_v16 = vld [vmem:[#allocation4 + $0x60] sm:$0xff]  ;;  %v411_v22 = vld [vmem:[#allocation4 + $0x10] sm:$0xff]  ;;  %407 = vst.msk [vmem:[#allocation3 + $0x8] sm:$0xf] %vm404_vm2, %v2387_v1 }
  0x6b   : > { %2050 = vmatpush3.bf16.msra.mxu0 %v2049_v9  ;;  %2039 = vmatprep.subr.bf16.mxu1 %v2385_v0  ;;  %s2617_s18 = scalar_lea.vmem %s2762_s0, %s1795_s25  ;;  %v648_v17 = vld [vmem:[#allocation4 + $0x68] sm:$0xff]  ;;  %v2043_v19 = vpack.c.bf16 %v410_v15, %v409_v14  ;;  %v412_v23 = vld [vmem:[#allocation4 + $0x18] sm:$0xff]  ;;  %v649_v24 = vld [vmem:[#allocation4 + $0x70] sm:$0xff]  ;;  %s1767_s27 = sshll.u32 %s394_s22, 3 }
  0x6c   : > { %2051 = vmatprep.subr.bf16.mxu0 %v2385_v0  ;;  %v413_v18 = vld [vmem:[%s2617_s18 + $0x1] sm:$0xff]  ;;  %v2055_v21 = vpack.c.bf16 %v648_v17, %v647_v16  ;;  %v650_v25 = vld [vmem:[#allocation4 + $0x78] sm:$0xff]  ;;  %v2046_v26 = vpack.c.bf16 %v412_v23, %v411_v22  ;;  %v729_v33 = vld [vmem:[#allocation4 + $0x90] sm:$0xff]  ;;  %s1792_s28 = sshll.u32 %s2465_s17, 7  ;;  %s396_s12 = scalar_lea.vmem [#allocation10], %s1767_s27 }
  0x6d   : > { %v565_v20 = vld [vmem:[%s2617_s18 + $0x2] sm:$0xff]  ;;  %v2058_v27 = vpack.c.bf16 %v650_v25, %v649_v24  ;;  %v730_v34 = vld [vmem:[#allocation4 + $0x98] sm:$0xff]  ;;  %v832_v40 = vld [vmem:[#allocation7 + $0x30] sm:$0xff]  ;;  %s2719_s19 = scalar_lea.hbm %s2772_s10, %s1792_s28  ;;  %s1654_s24 = scalar_lea.sflag [#allocation6], %s394_s22 }
  0x6e   : > { %2041 = vmatpush3.bf16.msra.mxu1 %v2040_v12  ;;  %v727_v28 = vld [vmem:[#allocation4 + $0x80] sm:$0xff]  ;;  %v728_v29 = vld [vmem:[#allocation4 + $0x88] sm:$0xff]  ;;  %v2064_v35 = vpack.c.bf16 %v730_v34, %v729_v33  ;;  %v833_v41 = vld [vmem:[#allocation7 + $0x38] sm:$0xff]  ;;  %p2798_p7 = scmp.ne.s32.totalorder %s2787_s23, 0  ;;  %s2388_s17 = smov [#allocation10]  }
  0x6f   : > { %2053 = vmatpush3.bf16.msra.mxu0 %v2052_v13  ;;  %2042 = vmatprep.subr.bf16.mxu1 %v2385_v0  ;;  %v408_v30 = vld [vmem:[%s2617_s18] sm:$0xff]  ;;  %v2061_v32 = vpack.c.bf16 %v728_v29, %v727_v28  ;;  %v831_v38 = vld [vmem:[#allocation7 + $0x28] sm:$0xff]  ;;  %v2070_v42 = vpack.c.bf16 %v833_v41, %v832_v40  ;;  %v826_v56 = vld [vmem:[#allocation7 + $0x10] sm:$0xff]  ;;  %s2312_s26 = sshll.u32 %s2388_s17, 4  ;;  %s2313_s26 = int_to_ptr.vmem [resolvable:$false] %s2312_s26 }
  0x70   : > { %2054 = vmatprep.subr.bf16.mxu0 %v2385_v0  ;;  %v645_v31 = vld [vmem:[%s2617_s18 + $0x3] sm:$0xff]  ;;  %v1775_v46 = vld [vmem:[%s2766_s4] ss:$0 sm:$0xff]  ;;  %v827_v57 = vld [vmem:[#allocation7 + $0x18] sm:$0xff]  ;;  %s2314_s29 = scalar_lea.vmem %s2313_s26, 256 }
  0x71   : > { %1880 = vmatmul.mubr.msk.f32.vlgmr.msra.gmra.mrb[0].mxu1 %vm402_vm0, %v413_v18  ;;  %v725_v36 = vld [vmem:[%s2617_s18 + $0x4] sm:$0xff]  ;;  %v1776_v49 = vld [vmem:[%s2769_s7] ss:$0 sm:$0xff]  ;;  %v2076_v59 = vpack.c.bf16 %v827_v57, %v826_v56  ;;  %v984_v63 = vld [vmem:[#allocation7 + $0x50] sm:$0xff]  ;;  %s1667_s18 = sshll.u32 %s396_s12, 4  ;;  %s2721_s18 = int_to_ptr.vmem [resolvable:$true] %s1667_s18 }
  0x72   : > { %1902 = vmatmul.mubr.msk.f32.vlgmr.msra.gmra.mrb[0].mxu0 %vm402_vm0, %v565_v20  ;;  %2044 = vmatpush3.bf16.msra.mxu1 %v2043_v19  ;;  %v830_v37 = vld [vmem:[#allocation7 + $0x20] sm:$0xff]  ;;  %v825_v54 = vld [vmem:[#allocation7 + $0x8] sm:$0xff]  ;;  %v985_v2 = vld [vmem:[#allocation7 + $0x58] sm:$0xff]  ;;  %s2308_s21 = scalar_lea.vmem %s2721_s18, 128  ;;  %p2315_p13 = scmp.lt.s32.totalorder %s2721_s18, %s2313_s26 }
  0x73   : > { %2056 = vmatpush3.bf16.msra.mxu0 %v2055_v21  ;;  %2045 = vmatprep.subr.bf16.mxu1 %v2385_v0  ;;  %v2067_v39 = vpack.c.bf16 %v831_v38, %v830_v37  ;;  %v824_v53 = vld [vmem:[#allocation7] sm:$0xff]  ;;  %v983_v61 = vld [vmem:[#allocation7 + $0x48] sm:$0xff]  ;;  %v2082_v4 = vpack.c.bf16 %v985_v2, %v984_v63  ;;  %v1064_v8 = vld [vmem:[#allocation7 + $0x70] sm:$0xff]  ;;  %p2309_p12 = scmp.ne.s32.totalorder %s2721_s18, %s2308_s21  ;;  %p2316_p1 = scmp.lt.s32.totalorder %s2314_s29, %s2308_s21 }
  0x74   : > { %2057 = vmatprep.subr.bf16.mxu0 %v2385_v0  ;;  %1890 = vmatprep.mubr.msk.f32.mxu1 %vm2386_vm1, %v2387_v1  ;;  %v2073_v55 = vpack.c.bf16 %v825_v54, %v824_v53  ;;  %v982_v60 = vld [vmem:[#allocation7 + $0x40] sm:$0xff]  ;;  %v1063_v6 = vld [vmem:[#allocation7 + $0x68] sm:$0xff]  ;;  %v1065_v9 = vld [vmem:[#allocation7 + $0x78] sm:$0xff] }
  0x75   : > { %1912 = vmatprep.mubr.msk.f32.mxu0 %vm2386_vm1, %v2387_v1  ;;  %v2079_v62 = vpack.c.bf16 %v983_v61, %v982_v60  ;;  %v1062_v5 = vld [vmem:[#allocation7 + $0x60] sm:$0xff]  ;;  %v2088_v11 = vpack.c.bf16 %v1065_v9, %v1064_v8  ;;  %v1143_v13 = vld [vmem:[#allocation7 + $0x88] sm:$0xff]  ;;  %v1144_v15 = vld [vmem:[#allocation7 + $0x90] sm:$0xff]  ;;  %p2310_p8 = pnand %p2309_p12, %p2798_p7  ;;  %p2317_p6 = por %p2316_p1, %p2315_p13 }
  0x76   : > { %2047 = vmatpush3.bf16.msra.mxu1 %v2046_v26  ;;  %v2085_v7 = vpack.c.bf16 %v1063_v6, %v1062_v5  ;;  %v1142_v12 = vld [vmem:[#allocation7 + $0x80] sm:$0xff]  ;;  %v1145_v16 = vld [vmem:[#allocation7 + $0x98] sm:$0xff]  ;;  %v1246_v21 = vld [vmem:[#allocation9 + $0x28] sm:$0xff] }
  0x77   : > { %2059 = vmatpush3.bf16.msra.mxu0 %v2058_v27  ;;  %2066 = vmatprep.subr.bf16.mxu1 %v2385_v0  ;;  %v2091_v14 = vpack.c.bf16 %v1143_v13, %v1142_v12  ;;  %v2094_v18 = vpack.c.bf16 %v1145_v16, %v1144_v15  ;;  %v1245_v20 = vld [vmem:[#allocation9 + $0x20] sm:$0xff]  ;;  %v1247_v23 = vld [vmem:[#allocation9 + $0x30] sm:$0xff]  ;;  %v1248_v24 = vld [vmem:[#allocation9 + $0x38] sm:$0xff]  ;;  %p2311_p11 = pneg %p2310_p8 }
  0x78   : > { %2060 = vmatprep.subr.bf16.mxu0 %v2385_v0  ;;  %v2097_v22 = vpack.c.bf16 %v1246_v21, %v1245_v20  ;;  %v2100_v25 = vpack.c.bf16 %v1248_v24, %v1247_v23  ;;  %v1782_v26 = vld [vmem:[%s2767_s5] ss:$0 sm:$0xff]  ;;  %v1240_v34 = vld [vmem:[#allocation9 + $0x8] sm:$0xff]  ;;  %v1242_v37 = vld [vmem:[#allocation9 + $0x18] sm:$0xff] }
  0x79   : > { %1891 = vmatmul.mubr.msk.f32.vlgmr.msra.gmra.mrb[0].mxu1 %vm402_vm0, %v408_v30  ;;  %v1783_v28 = vld [vmem:[%s2770_s8] ss:$0 sm:$0xff]  ;;  %v1398_v41 = vld [vmem:[#allocation9 + $0x48] sm:$0xff]  ;;  %v1559_v57 = vld [vmem:[#allocation9 + $0x90] sm:$0xff]  ;;  %p2318_p9 = pnand %p2317_p6, %p2311_p11 }
  0x7a   : > { %1913 = vmatmul.mubr.msk.f32.vlgmr.msra.gmra.mrb[0].mxu0 %vm402_vm0, %v645_v31  ;;  %1934 = vmatprep.mubr.msk.f32.mxu1 %vm2386_vm1, %v2387_v1  ;;  %v1239_v33 = vld [vmem:[#allocation9] sm:$0xff] }
  0x7b   : > { %2062 = vmatpush3.bf16.msra.mxu0 %v2061_v32  ;;  %1923 = vmatprep.mubr.msk.f32.mxu0 %vm2386_vm1, %v2387_v1  ;;  %v1397_v40 = vld [vmem:[#allocation9 + $0x40] sm:$0xff] }
  0x7c   : > { %2063 = vmatprep.subr.bf16.mxu0 %v2385_v0  ;;  %2068 = vmatpush3.bf16.msra.mxu1 %v2067_v39  ;;  %v1557_v54 = vld [vmem:[#allocation9 + $0x80] sm:$0xff] }
  0x7d   : > { %2069 = vmatprep.subr.bf16.mxu1 %v2385_v0  ;;  %v1790_v2 = vld [vmem:[%s2771_s9] ss:$0 sm:$0xff] }
  0x7f   : > { %2065 = vmatpush3.bf16.msra.mxu0 %v2064_v35  ;;  %v2103_v35 = vpack.c.bf16 %v1240_v34, %v1239_v33 }
  0x80   : > { %2096 = vmatprep.subr.bf16.mxu0 %v2385_v0  ;;  %2071 = vmatpush3.bf16.msra.mxu1 %v2070_v42  ;;  %v2109_v42 = vpack.c.bf16 %v1398_v41, %v1397_v40 }
  0x81   : > { %2072 = vmatprep.subr.bf16.mxu1 %v2385_v0 }
  0x82   : > { %1924 = vmatmul.mubr.msk.f32.vlgmr.msra.gmra.mrb[0].mxu0 %vm402_vm0, %v725_v36  ;;  %v1241_v36 = vld [vmem:[#allocation9 + $0x10] sm:$0xff] }
  0x83   : > { %1989 = vmatprep.mubr.msk.f32.mxu0 %vm2386_vm1, %v2387_v1  ;;  %2098 = vmatpush3.bf16.msra.mxu0 %v2097_v22  ;;  %v2106_v39 = vpack.c.bf16 %v1242_v37, %v1241_v36 }
  0x84   : > { %2099 = vmatprep.subr.bf16.mxu0 %v2385_v0 }
  0x87   : > { %2101 = vmatpush3.bf16.msra.mxu0 %v2100_v25 }
  0x88   : > { %2102 = vmatprep.subr.bf16.mxu0 %v2385_v0 }
 0x14c   : > { %v561_v43 = vpop.f32.mrb[0].mxu1 }
 0x14d   : > { %v1892_v44 = vpop.f32.mrb[1].mxu1 }
 0x14e   : > { %v1400_v44 = vld [vmem:[#allocation9 + $0x58] sm:$0xff] }
 0x155   : > { %v800_v45 = vpop.f32.mrb[0].mxu0 }
 0x156   : > { %v2126_v47 = vadd.f32 %v800_v45, %v561_v43  ;;  %v1925_v48 = vpop.f32.mrb[1].mxu0  ;;  %v1399_v43 = vld [vmem:[#allocation9 + $0x50] sm:$0xff] }
 0x157   : > { %v1478_v48 = vld [vmem:[#allocation9 + $0x68] sm:$0xff] }
 0x158   : > { %v812_v50 = vmul.f32 %v2126_v47, %v1775_v46  ;;  %v2112_v46 = vpack.c.bf16 %v1400_v44, %v1399_v43  ;;  %v1477_v47 = vld [vmem:[#allocation9 + $0x60] sm:$0xff] }
 0x15a   : > { %v820_v51 = vadd.f32 %v1776_v49, %v812_v50  ;;  %v2115_v49 = vpack.c.bf16 %v1478_v48, %v1477_v47  ;;  %v1479_v50 = vld [vmem:[#allocation9 + $0x70] sm:$0xff] }
 0x15c   : > { %v821_v52 = vmax.f32 %v820_v51, 0.0  ;;  %v1480_v51 = vld [vmem:[#allocation9 + $0x78] sm:$0xff] }
 0x15d   : > { %v2118_v53 = vpack.c.bf16 %v1480_v51, %v1479_v50 }
 0x15e   : > { %822 = vst.msk [vmem:[#allocation2 + $0x2] sm:$0xff] %vm402_vm0, %v821_v52 }
 0x165   : > { %v828_v58 = vld [vmem:[#allocation2 + $0x1] sm:$0xff] }
 0x166   : > { %1935 = vmatmul.mubr.msk.f32.vlgmr.msra.gmra.mrb[2].mxu1 %vm402_vm0, %v828_v58  ;;  %v823_v3 = vld [vmem:[#allocation2] sm:$0xff]  ;;  %v1560_v58 = vld [vmem:[#allocation9 + $0x98] sm:$0xff] }
 0x167   : > { %2074 = vmatpush3.bf16.msra.mxu1 %v2073_v55  ;;  %1945 = vmatprep.mubr.msk.f32.mxu1 %vm2386_vm1, %v2387_v1  ;;  %v980_v10 = vld [vmem:[#allocation2 + $0x2] sm:$0xff]  ;;  %v2124_v60 = vpack.c.bf16 %v1560_v58, %v1559_v57 }
 0x168   : > { %2075 = vmatprep.subr.bf16.mxu1 %v2385_v0  ;;  %v1060_v17 = vld [vmem:[#allocation2 + $0x3] sm:$0xff] }
 0x169   : > { %v1140_v19 = vld [vmem:[#allocation2 + $0x4] sm:$0xff] }
 0x16a   : > { %v1558_v55 = vld [vmem:[#allocation9 + $0x88] sm:$0xff] }
 0x16b   : > { %2077 = vmatpush3.bf16.msra.mxu1 %v2076_v59  ;;  %v2121_v56 = vpack.c.bf16 %v1558_v55, %v1557_v54 }
 0x16c   : > { %2078 = vmatprep.subr.bf16.mxu1 %v2385_v0 }
 0x16e   : > { %1946 = vmatmul.mubr.msk.f32.vlgmr.msra.gmra.mrb[2].mxu1 %vm402_vm0, %v823_v3 }
 0x16f   : > { %2080 = vmatpush3.bf16.msra.mxu1 %v2079_v62  ;;  %1956 = vmatprep.mubr.msk.f32.mxu1 %vm2386_vm1, %v2387_v1  ;;  %v1789_v62 = vld [vmem:[%s2768_s6] ss:$0 sm:$0xff] }
 0x170   : > { %2081 = vmatprep.subr.bf16.mxu1 %v2385_v0 }
 0x173   : > { %2083 = vmatpush3.bf16.msra.mxu1 %v2082_v4 }
 0x174   : > { %2084 = vmatprep.subr.bf16.mxu1 %v2385_v0 }
 0x176   : > { %1957 = vmatmul.mubr.msk.f32.vlgmr.msra.gmra.mrb[2].mxu1 %vm402_vm0, %v980_v10 }
 0x177   : > { %2086 = vmatpush3.bf16.msra.mxu1 %v2085_v7  ;;  %1967 = vmatprep.mubr.msk.f32.mxu1 %vm2386_vm1, %v2387_v1 }
 0x178   : > { %2087 = vmatprep.subr.bf16.mxu1 %v2385_v0 }
 0x17b   : > { %2089 = vmatpush3.bf16.msra.mxu1 %v2088_v11 }
 0x17c   : > { %2090 = vmatprep.subr.bf16.mxu1 %v2385_v0 }
 0x17e   : > { %1968 = vmatmul.mubr.msk.f32.vlgmr.msra.gmra.mrb[2].mxu1 %vm402_vm0, %v1060_v17 }
 0x17f   : > { %2092 = vmatpush3.bf16.msra.mxu1 %v2091_v14  ;;  %1978 = vmatprep.mubr.msk.f32.mxu1 %vm2386_vm1, %v2387_v1 }
 0x180   : > { %2093 = vmatprep.subr.bf16.mxu1 %v2385_v0 }
 0x183   : > { %2095 = vmatpush3.bf16.msra.mxu1 %v2094_v18 }
 0x186   : > { %1979 = vmatmul.mubr.msk.f32.vlgmr.msra.gmra.mrb[2].mxu1 %vm402_vm0, %v1140_v19 }
 0x259   : > { %v1215_v27 = vpop.f32.mrb[2].mxu1 }
 0x25a   : > { %v1227_v29 = vmul.f32 %v1782_v26, %v1215_v27  ;;  %v1980_v30 = vpop.f32.mrb[3].mxu1 }
 0x25c   : > { %v1235_v31 = vadd.f32 %v1783_v28, %v1227_v29 }
 0x25e   : > { %v1236_v32 = vmax.f32 %v1235_v31, 0.0 }
 0x260   : > { %1237 = vst.msk [vmem:[#allocation3 + $0x2] sm:$0xff] %vm402_vm0, %v1236_v32 }
 0x267   : > { %v1243_v38 = vld [vmem:[#allocation3 + $0x1] sm:$0xff] }
 0x268   : > { %1990 = vmatmul.mubr.msk.f32.vlgmr.msra.gmra.mrb[2].mxu0 %vm402_vm0, %v1243_v38  ;;  %v1238_v45 = vld [vmem:[#allocation3] sm:$0xff] }
 0x269   : > { %2104 = vmatpush3.bf16.msra.mxu0 %v2103_v35  ;;  %2000 = vmatprep.mubr.msk.f32.mxu0 %vm2386_vm1, %v2387_v1  ;;  %v1395_v52 = vld [vmem:[#allocation3 + $0x2] sm:$0xff] }
 0x26a   : > { %2105 = vmatprep.subr.bf16.mxu0 %v2385_v0  ;;  %v1475_v59 = vld [vmem:[#allocation3 + $0x3] sm:$0xff] }
 0x26b   : > { %v1555_v61 = vld [vmem:[#allocation3 + $0x4] sm:$0xff] }
 0x26d   : > { %2107 = vmatpush3.bf16.msra.mxu0 %v2106_v39 }
 0x26e   : > { %2108 = vmatprep.subr.bf16.mxu0 %v2385_v0 }
 0x270   : > { %2001 = vmatmul.mubr.msk.f32.vlgmr.msra.gmra.mrb[2].mxu0 %vm402_vm0, %v1238_v45 }
 0x271   : > { %2110 = vmatpush3.bf16.msra.mxu0 %v2109_v42  ;;  %2011 = vmatprep.mubr.msk.f32.mxu0 %vm2386_vm1, %v2387_v1 }
 0x272   : > { %2111 = vmatprep.subr.bf16.mxu0 %v2385_v0 }
 0x275   : > { %2113 = vmatpush3.bf16.msra.mxu0 %v2112_v46 }
 0x276   : > { %2114 = vmatprep.subr.bf16.mxu0 %v2385_v0 }
 0x278   : > { %2012 = vmatmul.mubr.msk.f32.vlgmr.msra.gmra.mrb[2].mxu0 %vm402_vm0, %v1395_v52 }
 0x279   : > { %2116 = vmatpush3.bf16.msra.mxu0 %v2115_v49  ;;  %2022 = vmatprep.mubr.msk.f32.mxu0 %vm2386_vm1, %v2387_v1 }
 0x27a   : > { %2117 = vmatprep.subr.bf16.mxu0 %v2385_v0 }
 0x27d   : > { %2119 = vmatpush3.bf16.msra.mxu0 %v2118_v53 }
 0x27e   : > { %2120 = vmatprep.subr.bf16.mxu0 %v2385_v0 }
 0x280   : > { %2023 = vmatmul.mubr.msk.f32.vlgmr.msra.gmra.mrb[2].mxu0 %vm402_vm0, %v1475_v59 }
 0x281   : > { %2122 = vmatpush3.bf16.msra.mxu0 %v2121_v56  ;;  %2033 = vmatprep.mubr.msk.f32.mxu0 %vm2386_vm1, %v2387_v1 }
 0x282   : > { %2123 = vmatprep.subr.bf16.mxu0 %v2385_v0 }
 0x285   : > { %2125 = vmatpush3.bf16.msra.mxu0 %v2124_v60 }
 0x288   : > { %2034 = vmatmul.mubr.msk.f32.vlgmr.msra.gmra.mrb[2].mxu0 %vm402_vm0, %v1555_v61 }
 0x35b   : > { %v1630_v63 = vpop.f32.mrb[2].mxu0 }
 0x35c   : > { %v1642_v3 = vmul.f32 %v1789_v62, %v1630_v63  ;;  %v2035_v1 = vpop.f32.mrb[3].mxu0 }
 0x35e   : > { %v1650_v0 = vadd.f32 %v1790_v2, %v1642_v3 }
 0x360   : > { %v1651_v4 = vmax.f32 %v1650_v0, 0.0 }
 0x362   : > { %1652 = vst.msk [vmem:[%s396_s12] sm:$0xff] %vm402_vm0, %v1651_v4 }
 0x363   : > { %2321 = shalt.err (!%p2318_p9)
}
 0x364   : > { %s2322_s11 = scalar_lea.hbm %s2719_s19, 128  ;;  %s2326_s30 = scalar_lea.hbm %s2772_s10, 256 }
 0x365   : > { %p2323_p2 = scmp.ne.s32.totalorder %s2719_s19, %s2322_s11  ;;  %p2327_p5 = scmp.lt.u32.totalorder %s2719_s19, %s2772_s10 }
 0x366   : > { %p2328_p10 = scmp.lt.u32.totalorder %s2326_s30, %s2322_s11  ;;  %p2330_p12 = scmp.lt.u32.totalorder %s2322_s11, %s2719_s19 }
 0x367   : > { %p2324_p0 = pnand %p2323_p2, %p2798_p7 }
 0x368   : > { %p2329_p4 = por %p2328_p10, %p2327_p5 }
 0x369   : > { %p2325_p3 = pneg %p2324_p0 }
 0x36a   : > { %p2331_p8 = por %p2330_p12, %p2329_p4 }
 0x36c   : > { %p2332_p11 = pnand %p2331_p8, %p2325_p3 }
 0x36e   : > { %2335 = shalt.err (!%p2332_p11)
}
 0x36f   : > { %2161 = dma.vmem_to_hbm [thread:$0]  (%p2798_p7), %s2721_s18, 128, %s2719_s19, %s1654_s24  }
 0x370 PF: > { %s2799_s25 = sld [smem:[#allocation16_spill]]  ;;  %s2800_s28 = sld [smem:[#allocation14_spill]] }
 0x371   : > { %s2801_s12 = sld [smem:[#allocation19_spill]] }
 0x376   : > { %p2183_p13 = scmp.ge.s32.totalorder %s2799_s25, 2  ;;  %s1679_s20 = sand.u32 1, %s2800_s28  }
 0x377   : > { %p2802_p1 = scmp.ne.s32.totalorder %s2801_s12, 0  ;;  %s1680_s16 = scalar_lea.sflag [#allocation6], %s1679_s20 }
 0x379   : > { %p2174_p6 = pnand %p2183_p13, %p2802_p1 }
 0x37b   : > { %2361 = dma.done.wait (!%p2174_p6), %s1680_s16, 128  }
 0x37c   : > { %2363 = vsyncadd (!%p2174_p6), %s1680_s16, 4294967168  ;;  %s2803_s16 = sld [smem:[#allocation17_spill]]  ;;  %s2804_s21 = sld [smem:[#allocation15_spill]] }
 0x37d   : > { %s2805_s15 = sld [smem:[#allocation18_spill]]  ;;  %s2806_s13 = smov %s2370_s14 }
 0x382   : > { %p22_p9 = scmp.ge.s32.totalorder %s2803_s16, 4   ;;  %s2807_s14 = smov %s2804_s21 }
 0x384   :  { %24 = sbr.rel (!%p22_p9) target bundleno = 5 (0x5), region = 120 }
 0x38b   :  { %1685 = vsyncpa [#allocation5], 1 }
 0x38c   :  { %1687 = vsyncpa [#allocation5 + $0x1], 1 }
 0x38d   :  { %1688 = vsyncpa [#allocation8], 1 }
 0x38e   :  { %1689 = vsyncpa [#allocation6], 1 }
 0x38f   :  { %1691 = vsyncpa [#allocation6 + $0x1], 1 }

</bundles_post_ra>
